<compile_context>
chip_gen: v6e
topology: v6e:2x2x1
jax: 0.10.0
libtpu: 0.0.40
codegen_flags: <defaults>
</compile_context>

<pallas_src>
import functools

import jax
import jax.numpy as jnp
from jax.experimental import pallas as pl
from jax.experimental.pallas import tpu as pltpu


def _round_up(x, m):
    return ((x + m - 1) // m) * m


def bert_output_kernel(x_ref, res_ref, w_ref, b_ref, g_ref, beta_ref, o_ref,
                       *, eps, inv_h):
    # dense: (tm, I) @ (I, H) -> (tm, H) on the MXU, f32 accumulation
    h = jnp.dot(x_ref[...], w_ref[...], preferred_element_type=jnp.float32)
    h = h + b_ref[...].astype(jnp.float32)           # bias, broadcast (1, H)
    # dropout: identity in eval mode
    h = h + res_ref[...].astype(jnp.float32)         # residual add
    # Fused single-pass LayerNorm statistics over the hidden (lane) axis:
    # one sweep for sum and sum-of-squares, multiply by precomputed 1/H.
    s1 = jnp.sum(h, axis=-1, keepdims=True)
    s2 = jnp.sum(h * h, axis=-1, keepdims=True)
    mean = s1 * inv_h
    var = s2 * inv_h - mean * mean
    normed = (h - mean) * jax.lax.rsqrt(var + eps)   # rsqrt -> EUP slot
    out = normed * g_ref[...].astype(jnp.float32) + beta_ref[...].astype(jnp.float32)
    o_ref[...] = out.astype(o_ref.dtype)


def bert_output(hidden_states, input_tensor, weight, bias, gamma, beta,
                *, eps=1e-12, tile_m=512, compute_dtype=jnp.bfloat16,
                vmem_budget_bytes=48 * 1024 * 1024):
    """hidden_states: (M, I); input_tensor: (M, H); weight: (I, H) (= W^T of
    the PyTorch Linear); bias/gamma/beta: (H,). Returns (M, H) in the input
    dtype.  compute_dtype=None keeps everything in the input dtype."""
    M, I = hidden_states.shape
    H = input_tensor.shape[-1]
    out_dtype = hidden_states.dtype

    # Optional low-precision streaming (MXU-native bf16); LN / accumulation
    # stay f32 inside the kernel.  Bias/gamma/beta stay f32.
    if compute_dtype is not None:
        hidden_states = hidden_states.astype(compute_dtype)
        input_tensor = input_tensor.astype(compute_dtype)
        weight = weight.astype(compute_dtype)
    x_dtype = hidden_states.dtype
    bpe_x = jnp.dtype(x_dtype).itemsize
    bpe_w = jnp.dtype(weight.dtype).itemsize
    bpe_o = jnp.dtype(out_dtype).itemsize

    # Row (sublane) alignment: 8 for 4-byte dtypes, 16 for 2-byte packing.
    row_align = 16 if bpe_x == 2 else 8

    # Clamp tile_m to the (aligned) problem size, keep it aligned.
    tile_m = max(row_align, min(tile_m, _round_up(M, row_align)))
    tile_m = _round_up(tile_m, row_align)

    def _vmem_bytes(tm):
        w_bytes = I * H * bpe_w                              # single-buffered
        stream = 2 * tm * I * bpe_x                          # x tiles (double buf)
        stream += 2 * tm * H * bpe_x                         # residual tiles
        stream += 2 * tm * H * bpe_o                         # output tiles
        params = 3 * H * 4                                   # bias/gamma/beta f32
        return w_bytes + stream + params

    # Shrink tile_m until the working set fits the VMEM budget (keeps the
    # same wrapper valid on v7x's 64 MiB VMEM as well as v5e/v6e's 128 MiB).
    while tile_m > row_align and _vmem_bytes(tile_m) > vmem_budget_bytes:
        tile_m = _round_up(max(row_align, tile_m // 2), row_align)

    # Pad M so the grid divides evenly; padded rows are computed and dropped.
    M_pad = _round_up(M, tile_m)
    if M_pad != M:
        hidden_states = jnp.pad(hidden_states, ((0, M_pad - M), (0, 0)))
        input_tensor = jnp.pad(input_tensor, ((0, M_pad - M), (0, 0)))

    bias2 = bias.astype(jnp.float32).reshape(1, H)
    gamma2 = gamma.astype(jnp.float32).reshape(1, H)
    beta2 = beta.astype(jnp.float32).reshape(1, H)

    kernel = functools.partial(bert_output_kernel, eps=float(eps), inv_h=1.0 / H)
    grid = (M_pad // tile_m,)

    vmem_limit = max(32 * 1024 * 1024, _vmem_bytes(tile_m) + (4 * 1024 * 1024))

    cost = pl.CostEstimate(
        flops=2 * M_pad * I * H + 10 * M_pad * H,
        transcendentals=M_pad,                                # one rsqrt per row
        bytes_accessed=(M_pad * I * bpe_x + M_pad * H * bpe_x +
                        M_pad * H * bpe_o + I * H * bpe_w + 3 * H * 4),
    )

    def _make_call(single_buffer_invariants):
        # Block-invariant inputs (constant index_map): single-buffer them to
        # avoid a useless second VMEM copy of the weight.
        inv_kw = ({"pipeline_mode": pl.Buffered(1)}
                  if single_buffer_invariants else {})
        in_specs = [
            pl.BlockSpec((tile_m, I), lambda i: (i, 0)),          # x tile
            pl.BlockSpec((tile_m, H), lambda i: (i, 0)),          # residual tile
            pl.BlockSpec((I, H), lambda i: (0, 0), **inv_kw),     # dense weight
            pl.BlockSpec((1, H), lambda i: (0, 0), **inv_kw),     # dense bias
            pl.BlockSpec((1, H), lambda i: (0, 0), **inv_kw),     # LN gamma
            pl.BlockSpec((1, H), lambda i: (0, 0), **inv_kw),     # LN beta
        ]
        return pl.pallas_call(
            kernel,
            out_shape=jax.ShapeDtypeStruct((M_pad, H), out_dtype),
            grid_spec=pltpu.PrefetchScalarGridSpec(
                num_scalar_prefetch=0,
                grid=grid,
                in_specs=in_specs,
                out_specs=pl.BlockSpec((tile_m, H), lambda i: (i, 0)),
            ),
            compiler_params=pltpu.CompilerParams(
                dimension_semantics=("parallel",),
                vmem_limit_bytes=int(vmem_limit),
            ),
            cost_estimate=cost,
        )

    args = (hidden_states, input_tensor, weight, bias2, gamma2, beta2)
    try:
        out = _make_call(True)(*args)
    except Exception:
        # Fallback if Buffered(1) is rejected by this jax/Mosaic version.
        out = _make_call(False)(*args)

    if M_pad != M:
        out = out[:M]
    return out


if __name__ == "__main__":
    # Small BERT-like config: hidden_size=32, intermediate_size=128
    batch, seq = 2, 8
    hidden_size, intermediate_size = 32, 128
    eps = 1e-12

    key = jax.random.PRNGKey(0)
    k1, k2, k3, k4 = jax.random.split(key, 4)

    M = batch * seq
    hidden_states = jax.random.normal(k1, (M, intermediate_size), dtype=jnp.float32)
    input_tensor = jax.random.normal(k2, (M, hidden_size), dtype=jnp.float32)

    # Deterministic parameter init (Linear weight stored as (I, H) = W^T)
    weight = jax.random.normal(k3, (intermediate_size, hidden_size),
                               dtype=jnp.float32) * 0.02
    bias = jax.random.normal(k4, (hidden_size,), dtype=jnp.float32) * 0.02
    gamma = jnp.ones((hidden_size,), dtype=jnp.float32)
    beta = jnp.zeros((hidden_size,), dtype=jnp.float32)

    # Pure-JAX reference
    h_ref = hidden_states @ weight + bias
    h_ref = h_ref + input_tensor
    mu = h_ref.mean(-1, keepdims=True)
    var = ((h_ref - mu) ** 2).mean(-1, keepdims=True)
    ref = (h_ref - mu) / jnp.sqrt(var + eps) * gamma + beta

    # Full-precision path (compute_dtype=None): tight check of the kernel math.
    out_f32 = bert_output(hidden_states, input_tensor, weight, bias, gamma, beta,
                          eps=eps, compute_dtype=None)
    out_f32 = jax.block_until_ready(out_f32)
    assert jnp.allclose(out_f32, ref, atol=1e-5, rtol=1e-5), "f32 mismatch vs reference"

    # Optimized default path (bf16 streaming, f32 accumulation): loose check.
    out_bf16 = bert_output(hidden_states, input_tensor, weight, bias, gamma, beta,
                           eps=eps)
    out_bf16 = jax.block_until_ready(out_bf16)
    assert jnp.allclose(out_bf16, ref, atol=5e-2, rtol=5e-2), "bf16 mismatch vs reference"

    print("KERNEL_OK")
</pallas_src>

<mosaic_0001>
module attributes {stable_mosaic.version = 11 : i64} {
  func.func @bert_output_kernel(%arg0: i32, %arg1: memref<16x128xf32, #tpu.memory_space<vmem>>, %arg2: memref<16x32xf32, #tpu.memory_space<vmem>>, %arg3: memref<128x32xf32, #tpu.memory_space<vmem>>, %arg4: memref<1x32xf32, #tpu.memory_space<vmem>>, %arg5: memref<1x32xf32, #tpu.memory_space<vmem>>, %arg6: memref<1x32xf32, #tpu.memory_space<vmem>>, %arg7: memref<16x32xf32, #tpu.memory_space<vmem>>) attributes {dimension_semantics = [#tpu.dimension_semantics<parallel>], iteration_bounds = array<i64: 1>, scalar_prefetch = 0 : i64, scratch_operands = 0 : i64, tpu.core_type = #tpu.core_type<tc>, window_params = [{transform_indices = @transform_0, window_bounds = array<i64: 16, 128>}, {transform_indices = @transform_1, window_bounds = array<i64: 16, 32>}, {pipeline_mode = #tpu.pipeline_mode<synchronous>, transform_indices = @transform_2, window_bounds = array<i64: 128, 32>}, {pipeline_mode = #tpu.pipeline_mode<synchronous>, transform_indices = @transform_3, window_bounds = array<i64: 1, 32>}, {pipeline_mode = #tpu.pipeline_mode<synchronous>, transform_indices = @transform_4, window_bounds = array<i64: 1, 32>}, {pipeline_mode = #tpu.pipeline_mode<synchronous>, transform_indices = @transform_5, window_bounds = array<i64: 1, 32>}, {transform_indices = @transform_6, window_bounds = array<i64: 16, 32>}]} {
    %c0 = arith.constant 0 : index
    %c0_0 = arith.constant 0 : index
    %0 = vector.load %arg1[%c0, %c0_0] : memref<16x128xf32, #tpu.memory_space<vmem>>, vector<16x128xf32>
    %c0_1 = arith.constant 0 : index
    %c0_2 = arith.constant 0 : index
    %1 = vector.load %arg3[%c0_1, %c0_2] : memref<128x32xf32, #tpu.memory_space<vmem>>, vector<128x32xf32>
    %cst = arith.constant dense<0.000000e+00> : vector<16x32xf32>
    %2 = tpu.matmul %0, %1, %cst {dimension_numbers = #tpu.dot_dimension_numbers<[1], [0], [0], [1], [0, 0, 1, 1], [], []>} : vector<16x128xf32>, vector<128x32xf32>, vector<16x32xf32> -> vector<16x32xf32>
    %c0_3 = arith.constant 0 : index
    %c0_4 = arith.constant 0 : index
    %3 = vector.load %arg4[%c0_3, %c0_4] : memref<1x32xf32, #tpu.memory_space<vmem>>, vector<1x32xf32>
    %4 = vector.broadcast %3 : vector<1x32xf32> to vector<16x32xf32>
    %5 = arith.addf %2, %4 : vector<16x32xf32>
    %c0_5 = arith.constant 0 : index
    %c0_6 = arith.constant 0 : index
    %6 = vector.load %arg2[%c0_5, %c0_6] : memref<16x32xf32, #tpu.memory_space<vmem>>, vector<16x32xf32>
    %7 = arith.addf %5, %6 : vector<16x32xf32>
    %cst_7 = arith.constant dense<0.000000e+00> : vector<16xf32>
    %8 = vector.multi_reduction <add>, %7, %cst_7 [1] : vector<16x32xf32> to vector<16xf32>
    %9 = vector.shape_cast %8 : vector<16xf32> to vector<16x1xf32>
    %10 = arith.mulf %7, %7 : vector<16x32xf32>
    %cst_8 = arith.constant dense<0.000000e+00> : vector<16xf32>
    %11 = vector.multi_reduction <add>, %10, %cst_8 [1] : vector<16x32xf32> to vector<16xf32>
    %12 = vector.shape_cast %11 : vector<16xf32> to vector<16x1xf32>
    %cst_9 = arith.constant 3.125000e-02 : f32
    %13 = vector.broadcast %cst_9 : f32 to vector<16x1xf32>
    %14 = arith.mulf %9, %13 : vector<16x1xf32>
    %cst_10 = arith.constant 3.125000e-02 : f32
    %15 = vector.broadcast %cst_10 : f32 to vector<16x1xf32>
    %16 = arith.mulf %12, %15 : vector<16x1xf32>
    %17 = arith.mulf %14, %14 : vector<16x1xf32>
    %18 = arith.subf %16, %17 : vector<16x1xf32>
    %19 = vector.broadcast %14 : vector<16x1xf32> to vector<16x32xf32>
    %20 = arith.subf %7, %19 : vector<16x32xf32>
    %cst_11 = arith.constant 9.99999996E-13 : f32
    %21 = vector.broadcast %cst_11 : f32 to vector<16x1xf32>
    %22 = arith.addf %18, %21 : vector<16x1xf32>
    %23 = math.rsqrt %22 : vector<16x1xf32>
    %24 = vector.broadcast %23 : vector<16x1xf32> to vector<16x32xf32>
    %25 = arith.mulf %20, %24 : vector<16x32xf32>
    %c0_12 = arith.constant 0 : index
    %c0_13 = arith.constant 0 : index
    %26 = vector.load %arg5[%c0_12, %c0_13] : memref<1x32xf32, #tpu.memory_space<vmem>>, vector<1x32xf32>
    %27 = vector.broadcast %26 : vector<1x32xf32> to vector<16x32xf32>
    %28 = arith.mulf %25, %27 : vector<16x32xf32>
    %c0_14 = arith.constant 0 : index
    %c0_15 = arith.constant 0 : index
    %29 = vector.load %arg6[%c0_14, %c0_15] : memref<1x32xf32, #tpu.memory_space<vmem>>, vector<1x32xf32>
    %30 = vector.broadcast %29 : vector<1x32xf32> to vector<16x32xf32>
    %31 = arith.addf %28, %30 : vector<16x32xf32>
    %c0_16 = arith.constant 0 : index
    %c0_17 = arith.constant 0 : index
    %32 = vector.load %arg7[%c0_16, %c0_17] : memref<16x32xf32, #tpu.memory_space<vmem>>, vector<16x32xf32>
    tpu.vector_store %arg7[%c0_16, %c0_17], %31 {strides = array<i32>} : memref<16x32xf32, #tpu.memory_space<vmem>>, vector<16x32xf32>,
    return
  }
  func.func @transform_0(%arg0: i32) -> (i32, i32) {
    %c0_i32 = arith.constant 0 : i32
    %c0_i32_0 = arith.constant 0 : i32
    return %arg0, %c0_i32 : i32, i32
  }
  func.func @transform_1(%arg0: i32) -> (i32, i32) {
    %c0_i32 = arith.constant 0 : i32
    %c0_i32_0 = arith.constant 0 : i32
    return %arg0, %c0_i32 : i32, i32
  }
  func.func @transform_2(%arg0: i32) -> (i32, i32) {
    %c0_i32 = arith.constant 0 : i32
    %c0_i32_0 = arith.constant 0 : i32
    %c0_i32_1 = arith.constant 0 : i32
    return %c0_i32, %c0_i32_0 : i32, i32
  }
  func.func @transform_3(%arg0: i32) -> (i32, i32) {
    %c0_i32 = arith.constant 0 : i32
    %c0_i32_0 = arith.constant 0 : i32
    %c0_i32_1 = arith.constant 0 : i32
    return %c0_i32, %c0_i32_0 : i32, i32
  }
  func.func @transform_4(%arg0: i32) -> (i32, i32) {
    %c0_i32 = arith.constant 0 : i32
    %c0_i32_0 = arith.constant 0 : i32
    %c0_i32_1 = arith.constant 0 : i32
    return %c0_i32, %c0_i32_0 : i32, i32
  }
  func.func @transform_5(%arg0: i32) -> (i32, i32) {
    %c0_i32 = arith.constant 0 : i32
    %c0_i32_0 = arith.constant 0 : i32
    %c0_i32_1 = arith.constant 0 : i32
    return %c0_i32, %c0_i32_0 : i32, i32
  }
  func.func @transform_6(%arg0: i32) -> (i32, i32) {
    %c0_i32 = arith.constant 0 : i32
    %c0_i32_0 = arith.constant 0 : i32
    return %arg0, %c0_i32 : i32, i32
  }
}

module attributes {stable_mosaic.version = 11 : i64} {
  func.func @bert_output_kernel(%arg0: i32, %arg1: memref<16x128xf32, #tpu.memory_space<vmem>>, %arg2: memref<16x32xf32, #tpu.memory_space<vmem>>, %arg3: memref<128x32xf32, #tpu.memory_space<vmem>>, %arg4: memref<1x32xf32, #tpu.memory_space<vmem>>, %arg5: memref<1x32xf32, #tpu.memory_space<vmem>>, %arg6: memref<1x32xf32, #tpu.memory_space<vmem>>, %arg7: memref<16x32xf32, #tpu.memory_space<vmem>>) attributes {dimension_semantics = [#tpu.dimension_semantics<parallel>], iteration_bounds = array<i64: 1>, scalar_prefetch = 0 : i64, scratch_operands = 0 : i64, tpu.core_type = #tpu.core_type<tc>, window_params = [{transform_indices = @transform_0, window_bounds = array<i64: 16, 128>}, {transform_indices = @transform_1, window_bounds = array<i64: 16, 32>}, {pipeline_mode = #tpu.pipeline_mode<synchronous>, transform_indices = @transform_2, window_bounds = array<i64: 128, 32>}, {pipeline_mode = #tpu.pipeline_mode<synchronous>, transform_indices = @transform_3, window_bounds = array<i64: 1, 32>}, {pipeline_mode = #tpu.pipeline_mode<synchronous>, transform_indices = @transform_4, window_bounds = array<i64: 1, 32>}, {pipeline_mode = #tpu.pipeline_mode<synchronous>, transform_indices = @transform_5, window_bounds = array<i64: 1, 32>}, {transform_indices = @transform_6, window_bounds = array<i64: 16, 32>}]} {
    %c0 = arith.constant 0 : index
    %c0_0 = arith.constant 0 : index
    %0 = vector.load %arg1[%c0, %c0_0] : memref<16x128xf32, #tpu.memory_space<vmem>>, vector<16x128xf32>
    %c0_1 = arith.constant 0 : index
    %c0_2 = arith.constant 0 : index
    %1 = vector.load %arg3[%c0_1, %c0_2] : memref<128x32xf32, #tpu.memory_space<vmem>>, vector<128x32xf32>
    %cst = arith.constant dense<0.000000e+00> : vector<16x32xf32>
    %2 = tpu.matmul %0, %1, %cst {dimension_numbers = #tpu.dot_dimension_numbers<[1], [0], [0], [1], [0, 0, 1, 1], [], []>} : vector<16x128xf32>, vector<128x32xf32>, vector<16x32xf32> -> vector<16x32xf32>
    %c0_3 = arith.constant 0 : index
    %c0_4 = arith.constant 0 : index
    %3 = vector.load %arg4[%c0_3, %c0_4] : memref<1x32xf32, #tpu.memory_space<vmem>>, vector<1x32xf32>
    %4 = vector.broadcast %3 : vector<1x32xf32> to vector<16x32xf32>
    %5 = arith.addf %2, %4 : vector<16x32xf32>
    %c0_5 = arith.constant 0 : index
    %c0_6 = arith.constant 0 : index
    %6 = vector.load %arg2[%c0_5, %c0_6] : memref<16x32xf32, #tpu.memory_space<vmem>>, vector<16x32xf32>
    %7 = arith.addf %5, %6 : vector<16x32xf32>
    %cst_7 = arith.constant dense<0.000000e+00> : vector<16xf32>
    %8 = vector.multi_reduction <add>, %7, %cst_7 [1] : vector<16x32xf32> to vector<16xf32>
    %9 = vector.shape_cast %8 : vector<16xf32> to vector<16x1xf32>
    %10 = arith.mulf %7, %7 : vector<16x32xf32>
    %cst_8 = arith.constant dense<0.000000e+00> : vector<16xf32>
    %11 = vector.multi_reduction <add>, %10, %cst_8 [1] : vector<16x32xf32> to vector<16xf32>
    %12 = vector.shape_cast %11 : vector<16xf32> to vector<16x1xf32>
    %cst_9 = arith.constant 3.125000e-02 : f32
    %13 = vector.broadcast %cst_9 : f32 to vector<16x1xf32>
    %14 = arith.mulf %9, %13 : vector<16x1xf32>
    %cst_10 = arith.constant 3.125000e-02 : f32
    %15 = vector.broadcast %cst_10 : f32 to vector<16x1xf32>
    %16 = arith.mulf %12, %15 : vector<16x1xf32>
    %17 = arith.mulf %14, %14 : vector<16x1xf32>
    %18 = arith.subf %16, %17 : vector<16x1xf32>
    %19 = vector.broadcast %14 : vector<16x1xf32> to vector<16x32xf32>
    %20 = arith.subf %7, %19 : vector<16x32xf32>
    %cst_11 = arith.constant 9.99999996E-13 : f32
    %21 = vector.broadcast %cst_11 : f32 to vector<16x1xf32>
    %22 = arith.addf %18, %21 : vector<16x1xf32>
    %23 = math.rsqrt %22 : vector<16x1xf32>
    %24 = vector.broadcast %23 : vector<16x1xf32> to vector<16x32xf32>
    %25 = arith.mulf %20, %24 : vector<16x32xf32>
    %c0_12 = arith.constant 0 : index
    %c0_13 = arith.constant 0 : index
    %26 = vector.load %arg5[%c0_12, %c0_13] : memref<1x32xf32, #tpu.memory_space<vmem>>, vector<1x32xf32>
    %27 = vector.broadcast %26 : vector<1x32xf32> to vector<16x32xf32>
    %28 = arith.mulf %25, %27 : vector<16x32xf32>
    %c0_14 = arith.constant 0 : index
    %c0_15 = arith.constant 0 : index
    %29 = vector.load %arg6[%c0_14, %c0_15] : memref<1x32xf32, #tpu.memory_space<vmem>>, vector<1x32xf32>
    %30 = vector.broadcast %29 : vector<1x32xf32> to vector<16x32xf32>
    %31 = arith.addf %28, %30 : vector<16x32xf32>
    %c0_16 = arith.constant 0 : index
    %c0_17 = arith.constant 0 : index
    %32 = vector.load %arg7[%c0_16, %c0_17] : memref<16x32xf32, #tpu.memory_space<vmem>>, vector<16x32xf32>
    tpu.vector_store %arg7[%c0_16, %c0_17], %31 {strides = array<i32>} : memref<16x32xf32, #tpu.memory_space<vmem>>, vector<16x32xf32>,
    return
  }
  func.func @transform_0(%arg0: i32) -> (i32, i32) {
    %c0_i32 = arith.constant 0 : i32
    %c0_i32_0 = arith.constant 0 : i32
    return %arg0, %c0_i32 : i32, i32
  }
  func.func @transform_1(%arg0: i32) -> (i32, i32) {
    %c0_i32 = arith.constant 0 : i32
    %c0_i32_0 = arith.constant 0 : i32
    return %arg0, %c0_i32 : i32, i32
  }
  func.func @transform_2(%arg0: i32) -> (i32, i32) {
    %c0_i32 = arith.constant 0 : i32
    %c0_i32_0 = arith.constant 0 : i32
    %c0_i32_1 = arith.constant 0 : i32
    return %c0_i32, %c0_i32_0 : i32, i32
  }
  func.func @transform_3(%arg0: i32) -> (i32, i32) {
    %c0_i32 = arith.constant 0 : i32
    %c0_i32_0 = arith.constant 0 : i32
    %c0_i32_1 = arith.constant 0 : i32
    return %c0_i32, %c0_i32_0 : i32, i32
  }
  func.func @transform_4(%arg0: i32) -> (i32, i32) {
    %c0_i32 = arith.constant 0 : i32
    %c0_i32_0 = arith.constant 0 : i32
    %c0_i32_1 = arith.constant 0 : i32
    return %c0_i32, %c0_i32_0 : i32, i32
  }
  func.func @transform_5(%arg0: i32) -> (i32, i32) {
    %c0_i32 = arith.constant 0 : i32
    %c0_i32_0 = arith.constant 0 : i32
    %c0_i32_1 = arith.constant 0 : i32
    return %c0_i32, %c0_i32_0 : i32, i32
  }
  func.func @transform_6(%arg0: i32) -> (i32, i32) {
    %c0_i32 = arith.constant 0 : i32
    %c0_i32_0 = arith.constant 0 : i32
    return %arg0, %c0_i32 : i32, i32
  }
}

</mosaic_0001>

<bundles_post_ra>
// kernel: tpu_custom_call.1
= control target key start
LH: loop header
LB: loop body
LE: loop exit
PB: predicated region body
PF: predicated region fallthrough
CT: control target
= control target key end

     0   :  { %s396_s0 = inlined_call_operand.vmem [shape: f32[16,128], index: 0, kind: input, shape index: {}]   ;;  %s397_s1 = inlined_call_operand.vmem [shape: f32[16,32], index: 1, kind: input, shape index: {}]   ;;  %s398_s2 = inlined_call_operand.vmem [shape: f32[128,32], index: 2, kind: input, shape index: {}]   ;;  %s399_s3 = inlined_call_operand.vmem [shape: f32[1,32], index: 3, kind: input, shape index: {}]   ;;  %s400_s4 = inlined_call_operand.vmem [shape: f32[1,32], index: 4, kind: input, shape index: {}]   ;;  %s401_s5 = inlined_call_operand.vmem [shape: f32[1,32], index: 5, kind: input, shape index: {}]   ;;  %s402_s6 = inlined_call_operand.hbm [shape: f32[16,32], index: 6, kind: output, shape index: {}]  }
   0x1   :  { %v41_v0 = vld [vmem:[%s398_s2 + $0x78] sm:$0xff]  ;;  %v40_v1 = vld [vmem:[%s398_s2 + $0x70] sm:$0xff]  ;;  %v39_v2 = vld [vmem:[%s398_s2 + $0x68] sm:$0xff] }
   0x2   :  { %216 = vmatprep.subr.mxu0 %v41_v0  ;;  %v38_v3 = vld [vmem:[%s398_s2 + $0x60] sm:$0xff]  ;;  %v37_v5 = vld [vmem:[%s398_s2 + $0x58] sm:$0xff] }
   0x3   :  { %217 = vmatpush3.msra.mxu0 %v41_v0  ;;  %v24_v4 = vld [vmem:[%s396_s0] sm:$0xff] }
   0x4   :  { %218 = vmatprep.subr.mxu0 %v40_v1  ;;  %248 = vmatprep.mubr.f32.mxu0 %v24_v4 }
   0x5   :  { %219 = vmatpush3.msra.mxu0 %v40_v1 }
   0x6   :  { %220 = vmatprep.subr.mxu0 %v39_v2 }
   0x7   :  { %221 = vmatpush3.msra.mxu0 %v39_v2 }
   0x8   :  { %11 = vsyncpa [#allocation3], 0  ;;  %222 = vmatprep.subr.mxu0 %v38_v3  ;;  %v36_v6 = vld [vmem:[%s398_s2 + $0x50] sm:$0xff]  ;;  %v35_v7 = vld [vmem:[%s398_s2 + $0x48] sm:$0xff]  ;;  %vm128_vm0 = vcmask 261120   ;;  %s280_s15 = smov [#allocation2]  }
   0x9   :  { %223 = vmatpush3.msra.mxu0 %v38_v3  ;;  %v34_v8 = vld [vmem:[%s398_s2 + $0x40] sm:$0xff]  ;;  %v33_v9 = vld [vmem:[%s398_s2 + $0x38] sm:$0xff]  ;;  %v32_v10 = vld [vmem:[%s398_s2 + $0x30] sm:$0xff]  ;;  %s184_s16 = sshll.u32 %s280_s15, 4  ;;  %s185_s16 = int_to_ptr.vmem [resolvable:$true] %s184_s16 }
   0xa   :  { %224 = vmatprep.subr.mxu0 %v37_v5  ;;  %v31_v11 = vld [vmem:[%s398_s2 + $0x28] sm:$0xff]  ;;  %v30_v12 = vld [vmem:[%s398_s2 + $0x20] sm:$0xff]  ;;  %v29_v13 = vld [vmem:[%s398_s2 + $0x18] sm:$0xff]  ;;  %p263_p1 = scmp.lt.s32.totalorder %s185_s16, %s185_s16 }
   0xb   :  { %225 = vmatpush3.msra.mxu0 %v37_v5  ;;  %v28_v14 = vld [vmem:[%s398_s2 + $0x10] sm:$0xff]  ;;  %v27_v15 = vld [vmem:[%s398_s2 + $0x8] sm:$0xff]  ;;  %v26_v16 = vld [vmem:[%s398_s2] sm:$0xff] }
   0xc   :  { %226 = vmatprep.subr.mxu0 %v36_v6  ;;  %v25_v17 = vld [vmem:[%s396_s0 + $0x8] sm:$0xff]  ;;  %v195_v18 = vld [vmem:[%s399_s3] ss:$0 sm:$0xff] }
   0xd   :  { %227 = vmatpush3.msra.mxu0 %v36_v6  ;;  %v125_v21 = vld [vmem:[%s397_s1 + $0x8] sm:$0xff]  ;;  %v124_v23 = vld [vmem:[%s397_s1] sm:$0xff] }
   0xe   :  { %228 = vmatprep.subr.mxu0 %v35_v7  ;;  %v196_v49 = vld [vmem:[%s400_s4] ss:$0 sm:$0xff]  ;;  %s258_s4 = scalar_lea.vmem %s185_s16, 256 }
   0xf   :  { %229 = vmatpush3.msra.mxu0 %v35_v7  ;;  %v197_v51 = vld [vmem:[%s401_s5] ss:$0 sm:$0xff]  ;;  %p259_p0 = scmp.ne.s32.totalorder %s185_s16, %s258_s4  ;;  %p264_p2 = scmp.lt.s32.totalorder %s258_s4, %s258_s4 }
  0x10   :  { %230 = vmatprep.subr.mxu0 %v34_v8 }
  0x11   :  { %231 = vmatpush3.msra.mxu0 %v34_v8  ;;  %p265_p3 = por %p264_p2, %p263_p1 }
  0x12   :  { %232 = vmatprep.subr.mxu0 %v33_v9 }
  0x13   :  { %233 = vmatpush3.msra.mxu0 %v33_v9  ;;  %p266_p4 = pnand %p265_p3, %p259_p0 }
  0x14   :  { %234 = vmatprep.subr.mxu0 %v32_v10 }
  0x15   :  { %235 = vmatpush3.msra.mxu0 %v32_v10 }
  0x16   :  { %236 = vmatprep.subr.mxu0 %v31_v11 }
  0x17   :  { %237 = vmatpush3.msra.mxu0 %v31_v11 }
  0x18   :  { %238 = vmatprep.subr.mxu0 %v30_v12 }
  0x19   :  { %239 = vmatpush3.msra.mxu0 %v30_v12 }
  0x1a   :  { %240 = vmatprep.subr.mxu0 %v29_v13 }
  0x1b   :  { %241 = vmatpush3.msra.mxu0 %v29_v13 }
  0x1c   :  { %242 = vmatprep.subr.mxu0 %v28_v14 }
  0x1d   :  { %243 = vmatpush3.msra.mxu0 %v28_v14 }
  0x1e   :  { %244 = vmatprep.subr.mxu0 %v27_v15 }
  0x1f   :  { %245 = vmatpush3.msra.mxu0 %v27_v15 }
  0x20   :  { %246 = vmatprep.subr.mxu0 %v26_v16 }
  0x21   :  { %247 = vmatpush3.msra.mxu0 %v26_v16 }
  0x22   :  { %249 = vmatmul.mubr.f32.vlgmr.msra.gmra.mxu0 %v25_v17 }
  0xe2   :  { %v250_v19 = vpop.f32.mrf.mxu0 }
  0xe3   :  { %v121_v20 = vadd.f32 %v250_v19, %v195_v18 }
  0xe4   :  { %v115_v22 = vpop.f32.mrf.mxu0 }
  0xe5   :  { %v116_v24 = vadd.f32 %v195_v18, %v115_v22  ;;  %v127_v25 = vadd.f32 %v125_v21, %v121_v20 }
  0xe7   :  { %v126_v26 = vadd.f32 %v124_v23, %v116_v24  ;;  %v136_v30 = vmul.f32 %v127_v25, %v127_v25  ;;  %v132_v31 = vsel %vm128_vm0, %v127_v25, 0.0 }
  0xe9   :  { %v129_v27 = vsel %vm128_vm0, %v126_v26, 0.0  ;;  %v135_v28 = vmul.f32 %v126_v26, %v126_v26  ;;  %v140_v32 = vsel %vm128_vm0, %v136_v30, 0.0 }
  0xea   :  { %130 = vadd.xlane.f32.xlu0 %v129_v27 }
  0xeb   :  { %v137_v29 = vsel %vm128_vm0, %v135_v28, 0.0 }
  0xec   :  { %138 = vadd.xlane.f32.xlu1 %v137_v29 }
  0xee   :  { %133 = vadd.xlane.f32.xlu0 %v132_v31 }
  0xf0   :  { %141 = vadd.xlane.f32.xlu1 %v140_v32 }
 0x173   :  { %v131_v33 = vpop.xlane.xlu0 %130 }
 0x174   :  { %v143_v34 = vmul.f32 0.03125, %v131_v33 }
 0x175   :  { %v139_v35 = vpop.xlane.xlu1 %138 }
 0x176   :  { %v147_v36 = vmul.f32 %v143_v34, %v143_v34  ;;  %v145_v37 = vmul.f32 0.03125, %v139_v35  ;;  %v151_v47 = vsub.f32 %v126_v26, %v143_v34 }
 0x177   :  { %v134_v38 = vpop.xlane.xlu0 %133 }
 0x178   :  { %v149_v39 = vsub.f32 %v145_v37, %v147_v36  ;;  %v144_v40 = vmul.f32 0.03125, %v134_v38 }
 0x179   :  { %v142_v41 = vpop.xlane.xlu1 %141 }
 0x17a   :  { %v153_v42 = vadd.f32 1e-12, %v149_v39  ;;  %v148_v43 = vmul.f32 %v144_v40, %v144_v40  ;;  %v146_v44 = vmul.f32 0.03125, %v142_v41  ;;  %v152_v52 = vsub.f32 %v127_v25, %v144_v40 }
 0x17c   :  { %254 = vrsqrt.f32 %v153_v42  ;;  %v150_v45 = vsub.f32 %v146_v44, %v148_v43 }
 0x17e   :  { %v154_v46 = vadd.f32 1e-12, %v150_v45 }
 0x180   :  { %256 = vrsqrt.f32 %v154_v46 }
 0x189   :  { %v255_v48 = vpop.eup %254 }
 0x18a   :  { %v157_v50 = vmul.f32 %v255_v48, %v151_v47 }
 0x18c   :  { %v166_v53 = vmul.f32 %v196_v49, %v157_v50 }
 0x18d   :  { %v257_v54 = vpop.eup %256 }
 0x18e   :  { %v158_v55 = vmul.f32 %v257_v54, %v152_v52  ;;  %v175_v56 = vadd.f32 %v197_v51, %v166_v53 }
 0x190   :  { %v167_v57 = vmul.f32 %v196_v49, %v158_v55  ;;  %177 = vst.msk [vmem:[#allocation2] sm:$0xff] %vm128_vm0, %v175_v56 }
 0x192   :  { %v176_v58 = vadd.f32 %v197_v51, %v167_v57 }
 0x194   :  { %178 = vst.msk [vmem:[#allocation2 + $0x8] sm:$0xff] %vm128_vm0, %v176_v58 }
 0x195   :  { %269 = shalt.err (!%p266_p4)
}
 0x196   :  { %s281_s5 = smov 128   ;;  %s282_s17 = smov 8  }
 0x197   :  { %190 = dma.vmem_to_hbm [thread:$0]  %s185_s16, 256, %s402_s6, [#allocation3], %s281_s5, %s281_s5, %s282_s17  }
 0x198   :  { %278 = dma.done.wait [#allocation3], 256  }
 0x199   :  { %279 = vsyncadd [#allocation3], 4294967040 }
 0x19a   :  { %194 = vsyncpa [#allocation3], 1 }

// kernel: tpu_custom_call.1
= control target key start
LH: loop header
LB: loop body
LE: loop exit
PB: predicated region body
PF: predicated region fallthrough
CT: control target
= control target key end

     0   :  { %s396_s0 = inlined_call_operand.vmem [shape: f32[16,128], index: 0, kind: input, shape index: {}]   ;;  %s397_s1 = inlined_call_operand.vmem [shape: f32[16,32], index: 1, kind: input, shape index: {}]   ;;  %s398_s2 = inlined_call_operand.vmem [shape: f32[128,32], index: 2, kind: input, shape index: {}]   ;;  %s399_s3 = inlined_call_operand.vmem [shape: f32[1,32], index: 3, kind: input, shape index: {}]   ;;  %s400_s4 = inlined_call_operand.vmem [shape: f32[1,32], index: 4, kind: input, shape index: {}]   ;;  %s401_s5 = inlined_call_operand.vmem [shape: f32[1,32], index: 5, kind: input, shape index: {}]   ;;  %s402_s6 = inlined_call_operand.hbm [shape: f32[16,32], index: 6, kind: output, shape index: {}]  }
   0x1   :  { %v41_v0 = vld [vmem:[%s398_s2 + $0x78] sm:$0xff]  ;;  %v40_v1 = vld [vmem:[%s398_s2 + $0x70] sm:$0xff]  ;;  %v39_v2 = vld [vmem:[%s398_s2 + $0x68] sm:$0xff] }
   0x2   :  { %216 = vmatprep.subr.mxu0 %v41_v0  ;;  %v38_v3 = vld [vmem:[%s398_s2 + $0x60] sm:$0xff]  ;;  %v37_v5 = vld [vmem:[%s398_s2 + $0x58] sm:$0xff] }
   0x3   :  { %217 = vmatpush3.msra.mxu0 %v41_v0  ;;  %v24_v4 = vld [vmem:[%s396_s0] sm:$0xff] }
   0x4   :  { %218 = vmatprep.subr.mxu0 %v40_v1  ;;  %248 = vmatprep.mubr.f32.mxu0 %v24_v4 }
   0x5   :  { %219 = vmatpush3.msra.mxu0 %v40_v1 }
   0x6   :  { %220 = vmatprep.subr.mxu0 %v39_v2 }
   0x7   :  { %221 = vmatpush3.msra.mxu0 %v39_v2 }
   0x8   :  { %11 = vsyncpa [#allocation3], 0  ;;  %222 = vmatprep.subr.mxu0 %v38_v3  ;;  %v36_v6 = vld [vmem:[%s398_s2 + $0x50] sm:$0xff]  ;;  %v35_v7 = vld [vmem:[%s398_s2 + $0x48] sm:$0xff]  ;;  %vm128_vm0 = vcmask 261120   ;;  %s280_s15 = smov [#allocation2]  }
   0x9   :  { %223 = vmatpush3.msra.mxu0 %v38_v3  ;;  %v34_v8 = vld [vmem:[%s398_s2 + $0x40] sm:$0xff]  ;;  %v33_v9 = vld [vmem:[%s398_s2 + $0x38] sm:$0xff]  ;;  %v32_v10 = vld [vmem:[%s398_s2 + $0x30] sm:$0xff]  ;;  %s184_s16 = sshll.u32 %s280_s15, 4  ;;  %s185_s16 = int_to_ptr.vmem [resolvable:$true] %s184_s16 }
   0xa   :  { %224 = vmatprep.subr.mxu0 %v37_v5  ;;  %v31_v11 = vld [vmem:[%s398_s2 + $0x28] sm:$0xff]  ;;  %v30_v12 = vld [vmem:[%s398_s2 + $0x20] sm:$0xff]  ;;  %v29_v13 = vld [vmem:[%s398_s2 + $0x18] sm:$0xff]  ;;  %p263_p1 = scmp.lt.s32.totalorder %s185_s16, %s185_s16 }
   0xb   :  { %225 = vmatpush3.msra.mxu0 %v37_v5  ;;  %v28_v14 = vld [vmem:[%s398_s2 + $0x10] sm:$0xff]  ;;  %v27_v15 = vld [vmem:[%s398_s2 + $0x8] sm:$0xff]  ;;  %v26_v16 = vld [vmem:[%s398_s2] sm:$0xff] }
   0xc   :  { %226 = vmatprep.subr.mxu0 %v36_v6  ;;  %v25_v17 = vld [vmem:[%s396_s0 + $0x8] sm:$0xff]  ;;  %v195_v18 = vld [vmem:[%s399_s3] ss:$0 sm:$0xff] }
   0xd   :  { %227 = vmatpush3.msra.mxu0 %v36_v6  ;;  %v125_v21 = vld [vmem:[%s397_s1 + $0x8] sm:$0xff]  ;;  %v124_v23 = vld [vmem:[%s397_s1] sm:$0xff] }
   0xe   :  { %228 = vmatprep.subr.mxu0 %v35_v7  ;;  %v196_v49 = vld [vmem:[%s400_s4] ss:$0 sm:$0xff]  ;;  %s258_s4 = scalar_lea.vmem %s185_s16, 256 }
   0xf   :  { %229 = vmatpush3.msra.mxu0 %v35_v7  ;;  %v197_v51 = vld [vmem:[%s401_s5] ss:$0 sm:$0xff]  ;;  %p259_p0 = scmp.ne.s32.totalorder %s185_s16, %s258_s4  ;;  %p264_p2 = scmp.lt.s32.totalorder %s258_s4, %s258_s4 }
  0x10   :  { %230 = vmatprep.subr.mxu0 %v34_v8 }
  0x11   :  { %231 = vmatpush3.msra.mxu0 %v34_v8  ;;  %p265_p3 = por %p264_p2, %p263_p1 }
  0x12   :  { %232 = vmatprep.subr.mxu0 %v33_v9 }
  0x13   :  { %233 = vmatpush3.msra.mxu0 %v33_v9  ;;  %p266_p4 = pnand %p265_p3, %p259_p0 }
  0x14   :  { %234 = vmatprep.subr.mxu0 %v32_v10 }
  0x15   :  { %235 = vmatpush3.msra.mxu0 %v32_v10 }
  0x16   :  { %236 = vmatprep.subr.mxu0 %v31_v11 }
  0x17   :  { %237 = vmatpush3.msra.mxu0 %v31_v11 }
  0x18   :  { %238 = vmatprep.subr.mxu0 %v30_v12 }
  0x19   :  { %239 = vmatpush3.msra.mxu0 %v30_v12 }
  0x1a   :  { %240 = vmatprep.subr.mxu0 %v29_v13 }
  0x1b   :  { %241 = vmatpush3.msra.mxu0 %v29_v13 }
  0x1c   :  { %242 = vmatprep.subr.mxu0 %v28_v14 }
  0x1d   :  { %243 = vmatpush3.msra.mxu0 %v28_v14 }
  0x1e   :  { %244 = vmatprep.subr.mxu0 %v27_v15 }
  0x1f   :  { %245 = vmatpush3.msra.mxu0 %v27_v15 }
  0x20   :  { %246 = vmatprep.subr.mxu0 %v26_v16 }
  0x21   :  { %247 = vmatpush3.msra.mxu0 %v26_v16 }
  0x22   :  { %249 = vmatmul.mubr.f32.vlgmr.msra.gmra.mxu0 %v25_v17 }
  0xe2   :  { %v250_v19 = vpop.f32.mrf.mxu0 }
  0xe3   :  { %v121_v20 = vadd.f32 %v250_v19, %v195_v18 }
  0xe4   :  { %v115_v22 = vpop.f32.mrf.mxu0 }
  0xe5   :  { %v116_v24 = vadd.f32 %v195_v18, %v115_v22  ;;  %v127_v25 = vadd.f32 %v125_v21, %v121_v20 }
  0xe7   :  { %v126_v26 = vadd.f32 %v124_v23, %v116_v24  ;;  %v136_v30 = vmul.f32 %v127_v25, %v127_v25  ;;  %v132_v31 = vsel %vm128_vm0, %v127_v25, 0.0 }
  0xe9   :  { %v129_v27 = vsel %vm128_vm0, %v126_v26, 0.0  ;;  %v135_v28 = vmul.f32 %v126_v26, %v126_v26  ;;  %v140_v32 = vsel %vm128_vm0, %v136_v30, 0.0 }
  0xea   :  { %130 = vadd.xlane.f32.xlu0 %v129_v27 }
  0xeb   :  { %v137_v29 = vsel %vm128_vm0, %v135_v28, 0.0 }
  0xec   :  { %138 = vadd.xlane.f32.xlu1 %v137_v29 }
  0xee   :  { %133 = vadd.xlane.f32.xlu0 %v132_v31 }
  0xf0   :  { %141 = vadd.xlane.f32.xlu1 %v140_v32 }
 0x173   :  { %v131_v33 = vpop.xlane.xlu0 %130 }
 0x174   :  { %v143_v34 = vmul.f32 0.03125, %v131_v33 }
 0x175   :  { %v139_v35 = vpop.xlane.xlu1 %138 }
 0x176   :  { %v147_v36 = vmul.f32 %v143_v34, %v143_v34  ;;  %v145_v37 = vmul.f32 0.03125, %v139_v35  ;;  %v151_v47 = vsub.f32 %v126_v26, %v143_v34 }
 0x177   :  { %v134_v38 = vpop.xlane.xlu0 %133 }
 0x178   :  { %v149_v39 = vsub.f32 %v145_v37, %v147_v36  ;;  %v144_v40 = vmul.f32 0.03125, %v134_v38 }
 0x179   :  { %v142_v41 = vpop.xlane.xlu1 %141 }
 0x17a   :  { %v153_v42 = vadd.f32 1e-12, %v149_v39  ;;  %v148_v43 = vmul.f32 %v144_v40, %v144_v40  ;;  %v146_v44 = vmul.f32 0.03125, %v142_v41  ;;  %v152_v52 = vsub.f32 %v127_v25, %v144_v40 }
 0x17c   :  { %254 = vrsqrt.f32 %v153_v42  ;;  %v150_v45 = vsub.f32 %v146_v44, %v148_v43 }
 0x17e   :  { %v154_v46 = vadd.f32 1e-12, %v150_v45 }
 0x180   :  { %256 = vrsqrt.f32 %v154_v46 }
 0x189   :  { %v255_v48 = vpop.eup %254 }
 0x18a   :  { %v157_v50 = vmul.f32 %v255_v48, %v151_v47 }
 0x18c   :  { %v166_v53 = vmul.f32 %v196_v49, %v157_v50 }
 0x18d   :  { %v257_v54 = vpop.eup %256 }
 0x18e   :  { %v158_v55 = vmul.f32 %v257_v54, %v152_v52  ;;  %v175_v56 = vadd.f32 %v197_v51, %v166_v53 }
 0x190   :  { %v167_v57 = vmul.f32 %v196_v49, %v158_v55  ;;  %177 = vst.msk [vmem:[#allocation2] sm:$0xff] %vm128_vm0, %v175_v56 }
 0x192   :  { %v176_v58 = vadd.f32 %v197_v51, %v167_v57 }
 0x194   :  { %178 = vst.msk [vmem:[#allocation2 + $0x8] sm:$0xff] %vm128_vm0, %v176_v58 }
 0x195   :  { %269 = shalt.err (!%p266_p4)
}
 0x196   :  { %s281_s5 = smov 128   ;;  %s282_s17 = smov 8  }
 0x197   :  { %190 = dma.vmem_to_hbm [thread:$0]  %s185_s16, 256, %s402_s6, [#allocation3], %s281_s5, %s281_s5, %s282_s17  }
 0x198   :  { %278 = dma.done.wait [#allocation3], 256  }
 0x199   :  { %279 = vsyncadd [#allocation3], 4294967040 }
 0x19a   :  { %194 = vsyncpa [#allocation3], 1 }

</bundles_post_ra>
